<compile_context>
chip_gen: v6e
topology: v6e:2x2x1
jax: 0.10.0
libtpu: 0.0.40
codegen_flags: <defaults>
</compile_context>

<pallas_src>
import jax
import jax.numpy as jnp
from jax import lax
from jax.experimental import pallas as pl
from jax.experimental.pallas import tpu as pltpu

T, B, D = 8, 2, 32
LAMBDA_ = 0.95
GAMMA = 0.99
LAMBDA_GAMMA = LAMBDA_ * GAMMA
VF_BIAS = 0.1  # deterministic bias of the linear value head


def gae_kernel(state_ref, next_state_ref, reward_ref, done_ref, w_ref, u_ref, adv_ref):
    # Streams arrive (T, D, Bt) with the batch on the 128-lane axis; bf16 in,
    # upcast once, everything accumulates in f32.
    s = state_ref[...].astype(jnp.float32)        # (T, D, Bt)
    ns = next_state_ref[...].astype(jnp.float32)  # (T, D, Bt)
    done = done_ref[...]                          # (T, Bt) f32
    not_done = 1.0 - done

    # Fused value-head difference: ((1-d) * ns - s) . w
    # VPU multiply + sublane (D-axis) reduce — skips the MXU for the N=1 head
    # and uses a single reduce instead of two (v_s, v_ns) reduces.
    w = w_ref[...]                                # (D, 1) f32, lane-broadcasts
    diff = not_done[:, None, :] * ns - s          # (T, D, Bt)
    v_diff = jnp.sum(diff * w[None, :, :], axis=1)  # (T, Bt)

    # Linear-head biases cancel except -VF_BIAS * done (keeps done=1 rows exact).
    td = reward_ref[...] + v_diff - VF_BIAS * done  # (T, Bt)

    # Closed-form reverse discounted cumsum: adv[t] = sum_{j>=t} (lg)^(j-t) td[j]
    # i.e. adv = U @ td. Single MXU push, single lane-dense output store.
    adv_ref[...] = jnp.dot(
        u_ref[...], td, preferred_element_type=jnp.float32
    ).astype(adv_ref.dtype)


def discount_matrix(t_len, decay):
    """Constant [T,T] upper-triangular matrix U[i,j] = decay**(j-i) for j>=i."""
    idx = jnp.arange(t_len)
    k = idx[None, :] - idx[:, None]  # j - i
    powers = jnp.power(jnp.float32(decay), jnp.maximum(k, 0).astype(jnp.float32))
    return jnp.where(k >= 0, powers, 0.0).astype(jnp.float32)


def _pick_b_tile(b_sz, t_len, d_feat, stream_bytes):
    """Lane-dense batch tile, sized against per-TC VMEM.

    Double-buffered state+next_state cost ~ 2 inputs * 2 bufs * T*tile*D*bytes.
    Keep that under ~24 MiB so it fits v7x's 32 MiB default-scoped VMEM
    (64 MiB physical) without raising vmem_limit_bytes; v5e/v6e have 128 MiB.
    """
    if b_sz <= 256:
        return b_sz  # toy / small batch: single full block
    per_lane_bytes = 2 * 2 * t_len * d_feat * stream_bytes
    budget = 24 << 20
    tile = min(2048, budget // per_lane_bytes)
    tile = max(128, (tile // 128) * 128)
    # At least 2 grid steps so the "parallel" axis can shard across v7x's 2 TCs.
    half = max(128, (b_sz // 2) // 128 * 128)
    return int(min(tile, half, b_sz))


def gae_pallas(state, next_state, reward, done, w_row, *, b_tile=None,
               stream_dtype=jnp.bfloat16):
    """state/next_state: (T, B, D); reward/done: (T, B); w_row: (1, D).

    The big streams are re-laid-out to (T, D, B) (batch on the lane axis) and
    cast to `stream_dtype` (bf16 halves HBM traffic; accumulation stays f32).
    Production callers should materialize trajectories in (T, D, B) natively
    to avoid the wrapper-side transpose.
    """
    t_len, b_sz, d_feat = state.shape
    stream_bytes = jnp.dtype(stream_dtype).itemsize
    if b_tile is None:
        b_tile = _pick_b_tile(b_sz, t_len, d_feat, stream_bytes)

    state_tdb = jnp.swapaxes(state, 1, 2).astype(stream_dtype)       # (T, D, B)
    next_state_tdb = jnp.swapaxes(next_state, 1, 2).astype(stream_dtype)
    w_col = w_row.reshape(d_feat, 1).astype(jnp.float32)             # (D, 1)
    u = discount_matrix(t_len, LAMBDA_GAMMA)                         # (T, T)

    grid = (pl.cdiv(b_sz, b_tile),)
    return pl.pallas_call(
        gae_kernel,
        out_shape=jax.ShapeDtypeStruct((t_len, b_sz), jnp.float32),
        grid=grid,
        in_specs=[
            pl.BlockSpec((t_len, d_feat, b_tile), lambda j: (0, 0, j)),  # state (T,D,Bt)
            pl.BlockSpec((t_len, d_feat, b_tile), lambda j: (0, 0, j)),  # next_state
            pl.BlockSpec((t_len, b_tile), lambda j: (0, j)),             # reward
            pl.BlockSpec((t_len, b_tile), lambda j: (0, j)),             # done
            pl.BlockSpec((d_feat, 1), lambda j: (0, 0)),                 # w column (resident)
            pl.BlockSpec((t_len, t_len), lambda j: (0, 0)),              # discount matrix U
        ],
        out_specs=pl.BlockSpec((t_len, b_tile), lambda j: (0, j)),
        compiler_params=pltpu.CompilerParams(
            dimension_semantics=("parallel",),
        ),
    )(state_tdb, next_state_tdb, reward, done, w_col, u)


def gae_reference(state, next_state, reward, done, w_row):
    """Pure-JAX reference matching the module semantics (f32 throughout)."""
    w = w_row[0]  # (D,)
    v_s = jnp.einsum("tbd,d->tb", state, w) + VF_BIAS
    v_ns = jnp.einsum("tbd,d->tb", next_state, w) + VF_BIAS
    td = reward + v_ns * (1.0 - done) - v_s

    def scan_fn(carry, x):
        carry = x + LAMBDA_GAMMA * carry
        return carry, carry

    _, adv_rev = lax.scan(scan_fn, jnp.zeros((td.shape[1],), jnp.float32), td[::-1])
    return adv_rev[::-1]


if __name__ == "__main__":
    key = jax.random.PRNGKey(0)
    k_s, k_ns, k_r, k_d, k_w = jax.random.split(key, 5)

    state = jax.random.normal(k_s, (T, B, D), dtype=jnp.float32)
    next_state = jax.random.normal(k_ns, (T, B, D), dtype=jnp.float32)
    reward = jax.random.normal(k_r, (T, B), dtype=jnp.float32)
    done = (jax.random.uniform(k_d, (T, B)) < 0.2).astype(jnp.float32)
    w_row = jax.random.normal(k_w, (1, D), dtype=jnp.float32) * 0.1

    adv = gae_pallas(state, next_state, reward, done, w_row)
    jax.block_until_ready(adv)

    assert adv.shape == (T, B) and adv.dtype == jnp.float32

    # Tight check: the kernel streams state/next_state in bf16, so compare
    # against the f32 reference evaluated on the same bf16-rounded inputs
    # (isolates kernel math from input quantization).
    state_q = state.astype(jnp.bfloat16).astype(jnp.float32)
    next_state_q = next_state.astype(jnp.bfloat16).astype(jnp.float32)
    ref_q = gae_reference(state_q, next_state_q, reward, done, w_row)
    assert jnp.allclose(adv, ref_q, atol=1e-4, rtol=1e-3), (adv, ref_q)

    # Sanity vs. full-precision reference (loose, accounts for bf16 streams).
    ref = gae_reference(state, next_state, reward, done, w_row)
    assert jnp.allclose(adv, ref, atol=5e-2, rtol=5e-2), (adv, ref)

    print("KERNEL_OK")
</pallas_src>

<mosaic_0001>
module attributes {stable_mosaic.version = 11 : i64} {
  func.func @gae_kernel(%arg0: i32, %arg1: memref<8x32x2xbf16, #tpu.memory_space<vmem>>, %arg2: memref<8x32x2xbf16, #tpu.memory_space<vmem>>, %arg3: memref<8x2xf32, #tpu.memory_space<vmem>>, %arg4: memref<8x2xf32, #tpu.memory_space<vmem>>, %arg5: memref<32x1xf32, #tpu.memory_space<vmem>>, %arg6: memref<8x8xf32, #tpu.memory_space<vmem>>, %arg7: memref<8x2xf32, #tpu.memory_space<vmem>>) attributes {dimension_semantics = [#tpu.dimension_semantics<parallel>], iteration_bounds = array<i64: 1>, scalar_prefetch = 0 : i64, scratch_operands = 0 : i64, tpu.core_type = #tpu.core_type<tc>, window_params = [{transform_indices = @transform_0, window_bounds = array<i64: 8, 32, 2>}, {transform_indices = @transform_1, window_bounds = array<i64: 8, 32, 2>}, {transform_indices = @transform_2, window_bounds = array<i64: 8, 2>}, {transform_indices = @transform_3, window_bounds = array<i64: 8, 2>}, {pipeline_mode = #tpu.pipeline_mode<synchronous>, transform_indices = @transform_4, window_bounds = array<i64: 32, 1>}, {pipeline_mode = #tpu.pipeline_mode<synchronous>, transform_indices = @transform_5, window_bounds = array<i64: 8, 8>}, {transform_indices = @transform_6, window_bounds = array<i64: 8, 2>}]} {
    %c0 = arith.constant 0 : index
    %c0_0 = arith.constant 0 : index
    %c0_1 = arith.constant 0 : index
    %0 = vector.load %arg1[%c0, %c0_0, %c0_1] : memref<8x32x2xbf16, #tpu.memory_space<vmem>>, vector<8x32x2xbf16>
    %1 = arith.extf %0 : vector<8x32x2xbf16> to vector<8x32x2xf32>
    %c0_2 = arith.constant 0 : index
    %c0_3 = arith.constant 0 : index
    %c0_4 = arith.constant 0 : index
    %2 = vector.load %arg2[%c0_2, %c0_3, %c0_4] : memref<8x32x2xbf16, #tpu.memory_space<vmem>>, vector<8x32x2xbf16>
    %3 = arith.extf %2 : vector<8x32x2xbf16> to vector<8x32x2xf32>
    %c0_5 = arith.constant 0 : index
    %c0_6 = arith.constant 0 : index
    %4 = vector.load %arg4[%c0_5, %c0_6] : memref<8x2xf32, #tpu.memory_space<vmem>>, vector<8x2xf32>
    %cst = arith.constant 1.000000e+00 : f32
    %5 = vector.broadcast %cst : f32 to vector<8x2xf32>
    %6 = arith.subf %5, %4 : vector<8x2xf32>
    %c0_7 = arith.constant 0 : index
    %c0_8 = arith.constant 0 : index
    %7 = vector.load %arg5[%c0_7, %c0_8] : memref<32x1xf32, #tpu.memory_space<vmem>>, vector<32x1xf32>
    %8 = vector.shape_cast %6 : vector<8x2xf32> to vector<8x1x2xf32>
    %9 = vector.broadcast %8 : vector<8x1x2xf32> to vector<8x32x2xf32>
    %10 = arith.mulf %9, %3 : vector<8x32x2xf32>
    %11 = arith.subf %10, %1 : vector<8x32x2xf32>
    %12 = vector.shape_cast %7 : vector<32x1xf32> to vector<1x32x1xf32>
    %13 = vector.broadcast %12 : vector<1x32x1xf32> to vector<8x32x2xf32>
    %14 = arith.mulf %11, %13 : vector<8x32x2xf32>
    %cst_9 = arith.constant dense<0.000000e+00> : vector<8x2xf32>
    %15 = vector.multi_reduction <add>, %14, %cst_9 [1] : vector<8x32x2xf32> to vector<8x2xf32>
    %c0_10 = arith.constant 0 : index
    %c0_11 = arith.constant 0 : index
    %16 = vector.load %arg3[%c0_10, %c0_11] : memref<8x2xf32, #tpu.memory_space<vmem>>, vector<8x2xf32>
    %17 = arith.addf %16, %15 : vector<8x2xf32>
    %cst_12 = arith.constant 1.000000e-01 : f32
    %18 = vector.broadcast %cst_12 : f32 to vector<8x2xf32>
    %19 = arith.mulf %18, %4 : vector<8x2xf32>
    %20 = arith.subf %17, %19 : vector<8x2xf32>
    %c0_13 = arith.constant 0 : index
    %c0_14 = arith.constant 0 : index
    %21 = vector.load %arg6[%c0_13, %c0_14] : memref<8x8xf32, #tpu.memory_space<vmem>>, vector<8x8xf32>
    %cst_15 = arith.constant dense<0.000000e+00> : vector<8x2xf32>
    %22 = tpu.matmul %21, %20, %cst_15 {dimension_numbers = #tpu.dot_dimension_numbers<[1], [0], [0], [1], [0, 0, 1, 1], [], []>} : vector<8x8xf32>, vector<8x2xf32>, vector<8x2xf32> -> vector<8x2xf32>
    %c0_16 = arith.constant 0 : index
    %c0_17 = arith.constant 0 : index
    %23 = vector.load %arg7[%c0_16, %c0_17] : memref<8x2xf32, #tpu.memory_space<vmem>>, vector<8x2xf32>
    tpu.vector_store %arg7[%c0_16, %c0_17], %22 {strides = array<i32>} : memref<8x2xf32, #tpu.memory_space<vmem>>, vector<8x2xf32>,
    return
  }
  func.func @transform_0(%arg0: i32) -> (i32, i32, i32) {
    %c0_i32 = arith.constant 0 : i32
    %c0_i32_0 = arith.constant 0 : i32
    %c0_i32_1 = arith.constant 0 : i32
    return %c0_i32, %c0_i32_0, %arg0 : i32, i32, i32
  }
  func.func @transform_1(%arg0: i32) -> (i32, i32, i32) {
    %c0_i32 = arith.constant 0 : i32
    %c0_i32_0 = arith.constant 0 : i32
    %c0_i32_1 = arith.constant 0 : i32
    return %c0_i32, %c0_i32_0, %arg0 : i32, i32, i32
  }
  func.func @transform_2(%arg0: i32) -> (i32, i32) {
    %c0_i32 = arith.constant 0 : i32
    %c0_i32_0 = arith.constant 0 : i32
    return %c0_i32, %arg0 : i32, i32
  }
  func.func @transform_3(%arg0: i32) -> (i32, i32) {
    %c0_i32 = arith.constant 0 : i32
    %c0_i32_0 = arith.constant 0 : i32
    return %c0_i32, %arg0 : i32, i32
  }
  func.func @transform_4(%arg0: i32) -> (i32, i32) {
    %c0_i32 = arith.constant 0 : i32
    %c0_i32_0 = arith.constant 0 : i32
    %c0_i32_1 = arith.constant 0 : i32
    return %c0_i32, %c0_i32_0 : i32, i32
  }
  func.func @transform_5(%arg0: i32) -> (i32, i32) {
    %c0_i32 = arith.constant 0 : i32
    %c0_i32_0 = arith.constant 0 : i32
    %c0_i32_1 = arith.constant 0 : i32
    return %c0_i32, %c0_i32_0 : i32, i32
  }
  func.func @transform_6(%arg0: i32) -> (i32, i32) {
    %c0_i32 = arith.constant 0 : i32
    %c0_i32_0 = arith.constant 0 : i32
    return %c0_i32, %arg0 : i32, i32
  }
}

</mosaic_0001>

<bundles_post_ra>
// kernel: tpu_custom_call.1
= control target key start
LH: loop header
LB: loop body
LE: loop exit
PB: predicated region body
PF: predicated region fallthrough
CT: control target
= control target key end

     0   :  { %v747_v0 = vmov 0   ;;  %v748_v5 = vmov 0.0   ;;  %vm749_vm0 = vmmov 0   ;;  %v750_v6 = vmov 1966171168   ;;  %s1162_s4 = inlined_call_operand.vmem [shape: f32[32,1], index: 4, kind: input, shape index: {}]   ;;  %s1163_s3 = inlined_call_operand.vmem [shape: f32[8,2], index: 3, kind: input, shape index: {}]   ;;  %s1164_s0 = inlined_call_operand.vmem [shape: bf16[8,32,2], index: 0, kind: input, shape index: {}]   ;;  %s1165_s1 = inlined_call_operand.vmem [shape: bf16[8,32,2], index: 1, kind: input, shape index: {}]   ;;  %s1166_s2 = inlined_call_operand.vmem [shape: f32[8,2], index: 2, kind: input, shape index: {}]   ;;  %s1167_s5 = inlined_call_operand.vmem [shape: f32[8,8], index: 5, kind: input, shape index: {}]   ;;  %s1168_s6 = inlined_call_operand.vmem [shape: f32[8,2], index: 6, kind: output, shape index: {}]  }
   0x1   :  { %746 = vset.pattern.permute.xlu1 %v747_v0  ;;  %745 = vset.pattern.permute.xlu0 %v747_v0  ;;  %v155_v1 = vld [vmem:[%s1162_s4 + $0x10] sm:$0xff]  ;;  %v153_v2 = vld [vmem:[%s1162_s4] sm:$0xff]  ;;  %v156_v3 = vld [vmem:[%s1162_s4 + $0x18] sm:$0xff]  ;;  %v160_v7 = vunpack.c.l.s4 %v750_v6  ;;  %v162_v8 = vlaneseq  ;;  %vm363_vm1 = vcmask 15360   ;;  %vm477_vm2 = vcmask 1041409  }
   0x2   :  { %323 = vperm.xlu1 %746, %v155_v1   ;;  %313 = vperm.xlu0 %745, %v153_v2   ;;  %v154_v4 = vld [vmem:[%s1162_s4 + $0x8] sm:$0xff]  ;;  %v801_v9 = vld [vmem:[%s1163_s3] sm:$0xff]  ;;  %v818_v14 = vld [vmem:[%s1164_s0 + $0x10] sm:$0xff]   ;;  %vm479_vm3 = vcmask 1042434   ;;  %vm481_vm4 = vcmask 1043459   ;;  %vm483_vm5 = vcmask 1044484  }
   0x3   :  { %736 = vmatprep.subr.mxu0 %v748_v5  ;;  %738 = vmatprep.mubr.msk.f32.mxu0 %vm749_vm0, %v748_v5  ;;  %1194 = vst [vmem:[#allocation2_spill] sm:$0xff] %v801_v9  ;;  %v806_v10 = vld [vmem:[%s1164_s0] sm:$0xff]   ;;  %v161_v11 = vunpack.c.0.s8 %v160_v7  ;;  %v808_v12 = vshrl.u32 %v162_v8, 7  ;;  %v813_v13 = vld [vmem:[%s1164_s0 + $0x8] sm:$0xff]   ;;  %v152_v15 = vsub.f32 1.0, %v801_v9  ;;  %v824_v16 = vld [vmem:[%s1164_s0 + $0x18] sm:$0xff]  }
   0x4   :  { %v831_v19 = vld [vmem:[%s1164_s0 + $0x20] sm:$0xff]   ;;  %v836_v20 = vld [vmem:[%s1164_s0 + $0x28] sm:$0xff]   ;;  %v844_v24 = vld [vmem:[%s1164_s0 + $0x30] sm:$0xff]   ;;  %vm485_vm6 = vcmask 1045509   ;;  %vm487_vm7 = vcmask 1046534   ;;  %vm489_vm8 = vcmask 1047559  }
   0x5   :  { %1195 = vst [vmem:[#allocation3_spill] sm:$0xff] %v831_v19  ;;  %1196 = vst [vmem:[#allocation4_spill] sm:$0xff] %v836_v20  ;;  %v849_v25 = vld [vmem:[%s1164_s0 + $0x38] sm:$0xff]   ;;  %v852_v26 = vsub.s32 %v161_v11, %v808_v12  ;;  %v860_v30 = vld [vmem:[%s1164_s0 + $0x40] sm:$0xff]   ;;  %v158_v32 = vcombine.high %v152_v15, %v152_v15  ;;  %v209_v41 = vsub.s32 0, %v808_v12  ;;  %vm496_vm9 = vcmask 64512  }
   0x6   :  { %328 = vperm.xlu1 %746, %v156_v3   ;;  %318 = vperm.xlu0 %745, %v154_v4   ;;  %1197 = vst [vmem:[#allocation5_spill] sm:$0xff] %v844_v24  ;;  %1198 = vst [vmem:[#allocation6_spill] sm:$0xff] %v849_v25  ;;  %v865_v31 = vld [vmem:[%s1164_s0 + $0x48] sm:$0xff]   ;;  %v874_v37 = vld [vmem:[%s1164_s0 + $0x50] sm:$0xff]  }
   0x7   :  { %1199 = vst [vmem:[#allocation7_spill] sm:$0xff] %v860_v30  ;;  %1200 = vst [vmem:[#allocation8_spill] sm:$0xff] %v865_v31  ;;  %v883_v42 = vld [vmem:[%s1164_s0 + $0x58] sm:$0xff]   ;;  %v888_v43 = vld [vmem:[%s1164_s0 + $0x60] sm:$0xff]   ;;  %v165_v49 = vrot.slane %v152_v15, %v852_v26  ;;  %v172_v55 = vrot.slane %v158_v32, %v852_v26 }
   0x8   :  { %1201 = vst [vmem:[#allocation9_spill] sm:$0xff] %v874_v37  ;;  %1202 = vst [vmem:[#allocation10_spill] sm:$0xff] %v883_v42  ;;  %v896_v47 = vld [vmem:[%s1164_s0 + $0x68] sm:$0xff]   ;;  %v901_v48 = vld [vmem:[%s1164_s0 + $0x70] sm:$0xff]  }
   0x9   :  { %1203 = vst [vmem:[#allocation11_spill] sm:$0xff] %v888_v43  ;;  %1204 = vst [vmem:[#allocation12_spill] sm:$0xff] %v896_v47  ;;  %v910_v53 = vld [vmem:[%s1164_s0 + $0x78] sm:$0xff]   ;;  %v915_v54 = vld [vmem:[%s1165_s1] sm:$0xff]   ;;  %v173_v8 = vcombine.high %v165_v49, %v165_v49  ;;  %v174_v3 = vcombine.high %v172_v55, %v172_v55  ;;  %v188_v50 = vrot.slane %v172_v55, %v852_v26 }
   0xa   :  { %1205 = vst [vmem:[#allocation13_spill] sm:$0xff] %v901_v48  ;;  %1206 = vst [vmem:[#allocation14_spill] sm:$0xff] %v910_v53  ;;  %v925_v60 = vld [vmem:[%s1165_s1 + $0x8] sm:$0xff]   ;;  %v934_v1 = vld [vmem:[%s1165_s1 + $0x10] sm:$0xff]   ;;  %v643_v11 = vunpack.c.h.bf16 %v915_v54  ;;  %v1207_v37 = vunpack.c.l.bf16 %v915_v54 }
   0xb   :  { %v939_v2 = vld [vmem:[%s1165_s1 + $0x18] sm:$0xff]   ;;  %v947_v6 = vld [vmem:[%s1165_s1 + $0x20] sm:$0xff]   ;;  %v952_v7 = vld [vmem:[%s1165_s1 + $0x28] sm:$0xff]   ;;  %v646_v15 = vunpack.c.l.bf16 %v925_v60  ;;  %v647_v32 = vunpack.c.h.bf16 %v925_v60  ;;  %v650_v0 = vunpack.c.l.bf16 %v934_v1  ;;  %v651_v63 = vunpack.c.h.bf16 %v934_v1 }
   0xc   :  { %v960_v4 = vld [vmem:[%s1165_s1 + $0x30] sm:$0xff]   ;;  %v654_v62 = vunpack.c.l.bf16 %v939_v2  ;;  %v655_v61 = vunpack.c.h.bf16 %v939_v2  ;;  %v969_v59 = vld [vmem:[%s1165_s1 + $0x38] sm:$0xff]   ;;  %v658_v60 = vunpack.c.l.bf16 %v947_v6  ;;  %v659_v58 = vunpack.c.h.bf16 %v947_v6  ;;  %v977_v56 = vld [vmem:[%s1165_s1 + $0x40] sm:$0xff]  }
   0xd   :  { %v662_v57 = vunpack.c.l.bf16 %v952_v7  ;;  %v982_v1 = vld [vmem:[%s1165_s1 + $0x48] sm:$0xff]   ;;  %v181_v2 = vrot.slane %v165_v49, %v852_v26  ;;  %v663_v52 = vunpack.c.h.bf16 %v952_v7  ;;  %v666_v51 = vunpack.c.l.bf16 %v960_v4  ;;  %v990_v6 = vld [vmem:[%s1165_s1 + $0x50] sm:$0xff]   ;;  %v729_v49 = vld [vmem:[%s1165_s1 + $0x58] sm:$0xff]  }
   0xe   :  { %v195_v46 = vrot.slane %v173_v8, %v852_v26  ;;  %v667_v45 = vunpack.c.h.bf16 %v960_v4  ;;  %v670_v44 = vunpack.c.l.bf16 %v969_v59  ;;  %v202_v7 = vrot.slane %v174_v3, %v852_v26  ;;  %v730_v4 = vld [vmem:[%s1165_s1 + $0x60] sm:$0xff]   ;;  %v731_v12 = vld [vmem:[%s1165_s1 + $0x68] sm:$0xff]   ;;  %v733_v34 = vld [vmem:[%s1165_s1 + $0x78] sm:$0xff]  }
   0xf   :  { %v671_v40 = vunpack.c.h.bf16 %v969_v59  ;;  %v674_v39 = vunpack.c.l.bf16 %v977_v56  ;;  %v675_v55 = vunpack.c.h.bf16 %v977_v56  ;;  %v678_v8 = vunpack.c.l.bf16 %v982_v1  ;;  %v732_v56 = vld [vmem:[%s1165_s1 + $0x70] sm:$0xff]  }
  0x10   :  { %v679_v38 = vunpack.c.h.bf16 %v982_v1  ;;  %v682_v36 = vunpack.c.l.bf16 %v990_v6  ;;  %v683_v26 = vunpack.c.h.bf16 %v990_v6  ;;  %v203_v59 = vcombine.high %v181_v2, %v181_v2 }
  0x11   :  { %v686_v3 = vunpack.c.l.bf16 %v729_v49  ;;  %v687_v35 = vunpack.c.h.bf16 %v729_v49  ;;  %v204_v1 = vcombine.high %v188_v50, %v188_v50  ;;  %v205_v33 = vcombine.high %v195_v46, %v195_v46 }
  0x12   :  { %v690_v29 = vunpack.c.l.bf16 %v730_v4  ;;  %v691_v28 = vunpack.c.h.bf16 %v730_v4  ;;  %v206_v6 = vcombine.high %v202_v7, %v202_v7  ;;  %v210_v27 = vrot.slane %v181_v2, %v209_v41 }
  0x13   :  { %v694_v23 = vunpack.c.l.bf16 %v731_v12  ;;  %v695_v22 = vunpack.c.h.bf16 %v731_v12  ;;  %v698_v21 = vunpack.c.l.bf16 %v732_v56  ;;  %v214_v18 = vrot.slane %v195_v46, %v209_v41 }
  0x14   :  { %v699_v17 = vunpack.c.h.bf16 %v732_v56  ;;  %v702_v5 = vunpack.c.l.bf16 %v733_v34  ;;  %v703_v9 = vunpack.c.h.bf16 %v733_v34  ;;  %v218_v53 = vrot.slane %v203_v59, %v209_v41 }
  0x15   :  { %v222_v48 = vrot.slane %v205_v33, %v209_v41  ;;  %v226_v49 = vrot.slane %v188_v50, %v209_v41  ;;  %v230_v47 = vrot.slane %v202_v7, %v209_v41  ;;  %v234_v43 = vrot.slane %v204_v1, %v209_v41 }
  0x16   :  { %v238_v42 = vrot.slane %v206_v6, %v209_v41  ;;  %v247_v31 = vmul.f32 %v1207_v37, %v210_v27  ;;  %v248_v30 = vmul.f32 %v643_v11, %v210_v27  ;;  %v249_v4 = vmul.f32 %v646_v15, %v210_v27 }
  0x17   :  { %v250_v25 = vmul.f32 %v647_v32, %v210_v27  ;;  %v251_v2 = vmul.f32 %v650_v0, %v214_v18  ;;  %v252_v24 = vmul.f32 %v651_v63, %v214_v18  ;;  %v253_v12 = vmul.f32 %v654_v62, %v214_v18 }
  0x18   :  { %v254_v20 = vmul.f32 %v655_v61, %v214_v18  ;;  %v255_v46 = vmul.f32 %v658_v60, %v218_v53  ;;  %v256_v56 = vmul.f32 %v659_v58, %v218_v53  ;;  %v257_v19 = vmul.f32 %v662_v57, %v218_v53 }
  0x19   :  { %v258_v34 = vmul.f32 %v663_v52, %v218_v53  ;;  %v259_v59 = vmul.f32 %v666_v51, %v222_v48  ;;  %v260_v33 = vmul.f32 %v667_v45, %v222_v48  ;;  %v261_v50 = vmul.f32 %v670_v44, %v222_v48 }
  0x1a   :  { %v262_v7 = vmul.f32 %v671_v40, %v222_v48  ;;  %v263_v1 = vmul.f32 %v674_v39, %v226_v49  ;;  %v264_v41 = vmul.f32 %v675_v55, %v226_v49  ;;  %v265_v6 = vmul.f32 %v678_v8, %v226_v49 }
  0x1b   :  { %v266_v54 = vmul.f32 %v679_v38, %v226_v49  ;;  %v267_v37 = vmul.f32 %v682_v36, %v230_v47  ;;  %v268_v11 = vmul.f32 %v683_v26, %v230_v47  ;;  %v269_v15 = vmul.f32 %v686_v3, %v230_v47  ;;  %v1228_v49 = vld [vmem:[#allocation7_spill] sm:$0xff] }
  0x1c   :  { %v270_v27 = vmul.f32 %v687_v35, %v230_v47  ;;  %v271_v0 = vmul.f32 %v690_v29, %v234_v43  ;;  %v272_v63 = vmul.f32 %v691_v28, %v234_v43  ;;  %v273_v62 = vmul.f32 %v694_v23, %v234_v43 }
  0x1d   :  { %v274_v18 = vmul.f32 %v695_v22, %v234_v43  ;;  %v275_v61 = vmul.f32 %v698_v21, %v238_v42  ;;  %v276_v58 = vmul.f32 %v699_v17, %v238_v42  ;;  %v277_v57 = vmul.f32 %v702_v5, %v238_v42 }
  0x1e   :  { %v278_v52 = vmul.f32 %v703_v9, %v238_v42  ;;  %v1208_v45 = vunpack.c.l.bf16 %v806_v10  ;;  %v1209_v39 = vunpack.c.h.bf16 %v806_v10  ;;  %v1210_v38 = vunpack.c.l.bf16 %v813_v13  ;;  %v1216_v10 = vld [vmem:[#allocation3_spill] sm:$0xff] }
  0x1f   :  { %v1211_v48 = vunpack.c.h.bf16 %v813_v13  ;;  %v1212_v28 = vunpack.c.l.bf16 %v818_v14  ;;  %v1213_v21 = vunpack.c.h.bf16 %v818_v14  ;;  %v1214_v9 = vunpack.c.l.bf16 %v824_v16  ;;  %v1219_v13 = vld [vmem:[#allocation4_spill] sm:$0xff]  ;;  %v1222_v14 = vld [vmem:[#allocation5_spill] sm:$0xff] }
  0x20   :  { %v279_v44 = vsub.f32 %v247_v31, %v1208_v45  ;;  %v280_v40 = vsub.f32 %v248_v30, %v1209_v39  ;;  %v281_v36 = vsub.f32 %v249_v4, %v1210_v38  ;;  %v1215_v29 = vunpack.c.h.bf16 %v824_v16  ;;  %v1225_v16 = vld [vmem:[#allocation6_spill] sm:$0xff]  ;;  %v1234_v39 = vld [vmem:[#allocation9_spill] sm:$0xff] }
  0x21   :  { %v282_v35 = vsub.f32 %v250_v25, %v1211_v48  ;;  %v283_v23 = vsub.f32 %v251_v2, %v1212_v28  ;;  %v284_v17 = vsub.f32 %v252_v24, %v1213_v21  ;;  %v285_v22 = vsub.f32 %v253_v12, %v1214_v9  ;;  %v1237_v28 = vld [vmem:[#allocation10_spill] sm:$0xff] }
  0x22   :  { %v286_v31 = vsub.f32 %v254_v20, %v1215_v29  ;;  %v1217_v30 = vunpack.c.l.bf16 %v1216_v10  ;;  %v1218_v43 = vunpack.c.h.bf16 %v1216_v10  ;;  %v1220_v25 = vunpack.c.l.bf16 %v1219_v13 }
  0x23   :  { %v1221_v53 = vunpack.c.h.bf16 %v1219_v13  ;;  %v1223_v24 = vunpack.c.l.bf16 %v1222_v14  ;;  %v1224_v60 = vunpack.c.h.bf16 %v1222_v14  ;;  %v1226_v20 = vunpack.c.l.bf16 %v1225_v16  ;;  %v1246_v14 = vld [vmem:[#allocation13_spill] sm:$0xff] }
  0x24   :  { %v287_v42 = vsub.f32 %v255_v46, %v1217_v30  ;;  %v288_v47 = vsub.f32 %v256_v56, %v1218_v43  ;;  %v289_v51 = vsub.f32 %v257_v19, %v1220_v25  ;;  %v1227_v26 = vunpack.c.h.bf16 %v1225_v16  ;;  %v1231_v46 = vld [vmem:[#allocation8_spill] sm:$0xff]  ;;  %v1249_v16 = vld [vmem:[#allocation14_spill] sm:$0xff] }
  0x25   :  { %v290_v5 = vsub.f32 %v258_v34, %v1221_v53  ;;  %v291_v32 = vsub.f32 %v259_v59, %v1223_v24  ;;  %v292_v55 = vsub.f32 %v260_v33, %v1224_v60  ;;  %v293_v8 = vsub.f32 %v261_v50, %v1226_v20 }
  0x26   :  { %v294_v3 = vsub.f32 %v262_v7, %v1227_v26  ;;  %v1229_v4 = vunpack.c.l.bf16 %v1228_v49  ;;  %v1230_v19 = vunpack.c.h.bf16 %v1228_v49  ;;  %v1232_v56 = vunpack.c.l.bf16 %v1231_v46 }
  0x27   :  { %v1233_v59 = vunpack.c.h.bf16 %v1231_v46  ;;  %v1235_v33 = vunpack.c.l.bf16 %v1234_v39  ;;  %v1236_v50 = vunpack.c.h.bf16 %v1234_v39  ;;  %v1238_v7 = vunpack.c.l.bf16 %v1237_v28 }
  0x28   :  { %v295_v2 = vsub.f32 %v263_v1, %v1229_v4  ;;  %v296_v12 = vsub.f32 %v264_v41, %v1230_v19  ;;  %v297_v34 = vsub.f32 %v265_v6, %v1232_v56  ;;  %v1239_v1 = vunpack.c.h.bf16 %v1237_v28  ;;  %v1240_v41 = vld [vmem:[#allocation11_spill] sm:$0xff] }
  0x29   :  { %v298_v45 = vsub.f32 %v266_v54, %v1233_v59  ;;  %v299_v38 = vsub.f32 %v267_v37, %v1235_v33  ;;  %v300_v48 = vsub.f32 %v268_v11, %v1236_v50  ;;  %v301_v21 = vsub.f32 %v269_v15, %v1238_v7  ;;  %v1243_v54 = vld [vmem:[#allocation12_spill] sm:$0xff] }
  0x2a   :  { %v302_v9 = vsub.f32 %v270_v27, %v1239_v1  ;;  %v1241_v29 = vunpack.c.l.bf16 %v1240_v41  ;;  %v1242_v6 = vunpack.c.h.bf16 %v1240_v41  ;;  %v1244_v43 = vunpack.c.l.bf16 %v1243_v54 }
  0x2b   :  { %v1245_v11 = vunpack.c.h.bf16 %v1243_v54  ;;  %v1247_v15 = vunpack.c.l.bf16 %v1246_v14  ;;  %v1248_v60 = vunpack.c.h.bf16 %v1246_v14  ;;  %v1250_v20 = vunpack.c.l.bf16 %v1249_v16 }
  0x2c   :  { %v303_v10 = vsub.f32 %v271_v0, %v1241_v29  ;;  %v304_v30 = vsub.f32 %v272_v63, %v1242_v6  ;;  %v305_v13 = vsub.f32 %v273_v62, %v1244_v43  ;;  %v1251_v26 = vunpack.c.h.bf16 %v1249_v16 }
  0x2d   :  { %v306_v53 = vsub.f32 %v274_v18, %v1245_v11  ;;  %v307_v24 = vsub.f32 %v275_v61, %v1247_v15  ;;  %v308_v27 = vsub.f32 %v276_v58, %v1248_v60  ;;  %v309_v0 = vsub.f32 %v277_v57, %v1250_v20 }
  0x2e   :  { %v1086_v63 = vsub.f32 %v278_v52, %v1251_v26 }
  0x7d   :  { %v324_v37 = vpop.permute.xlu1 %323  ;;  %v314_v25 = vpop.permute.xlu0 %313 }
  0x7e   :  { %v331_v49 = vmul.f32 %v314_v25, %v279_v44  ;;  %v333_v62 = vmul.f32 %v324_v37, %v281_v36  ;;  %v335_v4 = vmul.f32 %v314_v25, %v283_v23  ;;  %v337_v19 = vmul.f32 %v324_v37, %v285_v22 }
  0x7f   :  { %v339_v46 = vmul.f32 %v314_v25, %v287_v42  ;;  %v341_v56 = vmul.f32 %v324_v37, %v289_v51  ;;  %v343_v18 = vmul.f32 %v314_v25, %v291_v32  ;;  %v345_v59 = vmul.f32 %v324_v37, %v293_v8 }
  0x80   :  { %v347_v39 = vmul.f32 %v314_v25, %v295_v2  ;;  %v349_v61 = vmul.f32 %v324_v37, %v297_v34  ;;  %v351_v33 = vmul.f32 %v314_v25, %v299_v38  ;;  %v353_v28 = vmul.f32 %v324_v37, %v301_v21 }
  0x81   :  { %v1088_v50 = vpop.permute.xlu1 %328  ;;  %v319_v58 = vpop.permute.xlu0 %318  ;;  %v1090_v57 = vmul.f32 %v314_v25, %v303_v10  ;;  %v1092_v7 = vmul.f32 %v324_v37, %v305_v13  ;;  %v1094_v52 = vmul.f32 %v314_v25, %v307_v24  ;;  %v1097_v22 = vmul.f32 %v324_v37, %v309_v0 }
  0x82   :  { %v332_v44 = vmul.f32 %v319_v58, %v280_v40  ;;  %v334_v36 = vmul.f32 %v1088_v50, %v282_v35  ;;  %v336_v23 = vmul.f32 %v319_v58, %v284_v17  ;;  %v338_v42 = vmul.f32 %v1088_v50, %v286_v31 }
  0x83   :  { %v340_v51 = vmul.f32 %v319_v58, %v288_v47  ;;  %v342_v32 = vmul.f32 %v1088_v50, %v290_v5  ;;  %v344_v8 = vmul.f32 %v319_v58, %v292_v55  ;;  %v346_v2 = vmul.f32 %v1088_v50, %v294_v3 }
  0x84   :  { %v348_v34 = vmul.f32 %v319_v58, %v296_v12  ;;  %v350_v38 = vmul.f32 %v1088_v50, %v298_v45  ;;  %v352_v21 = vmul.f32 %v319_v58, %v300_v48  ;;  %v354_v1 = vmul.f32 %v1088_v50, %v302_v9 }
  0x85   :  { %v356_v40 = vmul.f32 %v319_v58, %v304_v30  ;;  %v1105_v35 = vmul.f32 %v1088_v50, %v306_v53  ;;  %v1107_v17 = vmul.f32 %v319_v58, %v308_v27  ;;  %v364_v31 = vsel %vm363_vm1, %v331_v49, 0.0 }
  0x86   :  { %v365_v47 = vsel %vm363_vm1, %v332_v44, 0.0  ;;  %v367_v5 = vsel %vm363_vm1, %v333_v62, 0.0  ;;  %v369_v55 = vsel %vm363_vm1, %v334_v36, 0.0  ;;  %v377_v12 = vsel %vm363_vm1, %v335_v4, 0.0 }
  0x87   :  { %v366_v3 = vadd.f32 %v365_v47, %v364_v31  ;;  %v378_v45 = vsel %vm363_vm1, %v336_v23, 0.0  ;;  %v380_v48 = vsel %vm363_vm1, %v337_v19, 0.0  ;;  %v382_v41 = vsel %vm363_vm1, %v338_v42, 0.0 }
  0x88   :  { %v379_v9 = vadd.f32 %v378_v45, %v377_v12  ;;  %v390_v29 = vsel %vm363_vm1, %v339_v46, 0.0  ;;  %v391_v10 = vsel %vm363_vm1, %v340_v51, 0.0  ;;  %v393_v54 = vsel %vm363_vm1, %v341_v56, 0.0 }
  0x89   :  { %v368_v6 = vadd.f32 %v367_v5, %v366_v3  ;;  %v392_v30 = vadd.f32 %v391_v10, %v390_v29  ;;  %v395_v43 = vsel %vm363_vm1, %v342_v32, 0.0  ;;  %v403_v37 = vsel %vm363_vm1, %v343_v18, 0.0 }
  0x8a   :  { %v381_v13 = vadd.f32 %v380_v48, %v379_v9  ;;  %v404_v25 = vsel %vm363_vm1, %v344_v8, 0.0  ;;  %v406_v11 = vsel %vm363_vm1, %v345_v59, 0.0  ;;  %v408_v24 = vsel %vm363_vm1, %v346_v2, 0.0 }
  0x8b   :  { %v370_v53 = vadd.f32 %v369_v55, %v368_v6  ;;  %v394_v14 = vadd.f32 %v393_v54, %v392_v30  ;;  %v405_v15 = vadd.f32 %v404_v25, %v403_v37  ;;  %v416_v27 = vsel %vm363_vm1, %v347_v39, 0.0 }
  0x8c   :  { %v383_v60 = vadd.f32 %v382_v41, %v381_v13  ;;  %v417_v16 = vsel %vm363_vm1, %v348_v34, 0.0  ;;  %v419_v20 = vsel %vm363_vm1, %v349_v61, 0.0  ;;  %v421_v19 = vsel %vm363_vm1, %v350_v38, 0.0 }
  0x8d   :  { %v371_v0 = vrot.slane %v370_v53, 4  ;;  %v396_v26 = vadd.f32 %v395_v43, %v394_v14  ;;  %v407_v49 = vadd.f32 %v406_v11, %v405_v15  ;;  %v418_v62 = vadd.f32 %v417_v16, %v416_v27 }
  0x8e   :  { %v384_v4 = vrot.slane %v383_v60, 4  ;;  %v429_v46 = vsel %vm363_vm1, %v351_v33, 0.0  ;;  %v430_v56 = vsel %vm363_vm1, %v352_v21, 0.0  ;;  %v432_v23 = vsel %vm363_vm1, %v353_v28, 0.0 }
  0x8f   :  { %v372_v18 = vadd.f32 %v371_v0, %v370_v53  ;;  %v397_v59 = vrot.slane %v396_v26, 4  ;;  %v409_v58 = vadd.f32 %v408_v24, %v407_v49  ;;  %v420_v44 = vadd.f32 %v419_v20, %v418_v62 }
  0x90   :  { %v385_v39 = vadd.f32 %v384_v4, %v383_v60  ;;  %v431_v36 = vadd.f32 %v430_v56, %v429_v46  ;;  %v434_v61 = vsel %vm363_vm1, %v354_v1, 0.0  ;;  %v442_v33 = vsel %vm363_vm1, %v1090_v57, 0.0 }
  0x91   :  { %v373_v42 = vrot.slane %v372_v18, 2  ;;  %v398_v51 = vadd.f32 %v397_v59, %v396_v26  ;;  %v410_v32 = vrot.slane %v409_v58, 4  ;;  %v422_v8 = vadd.f32 %v421_v19, %v420_v44 }
  0x92   :  { %v386_v2 = vrot.slane %v385_v39, 2  ;;  %v433_v34 = vadd.f32 %v432_v23, %v431_v36  ;;  %v443_v38 = vsel %vm363_vm1, %v356_v40, 0.0  ;;  %v445_v3 = vsel %vm363_vm1, %v1092_v7, 0.0 }
  0x93   :  { %v374_v21 = vadd.f32 %v373_v42, %v372_v18  ;;  %v399_v31 = vrot.slane %v398_v51, 2  ;;  %v411_v47 = vadd.f32 %v410_v32, %v409_v58  ;;  %v423_v5 = vrot.slane %v422_v8, 4 }
  0x94   :  { %v387_v28 = vadd.f32 %v386_v2, %v385_v39  ;;  %v435_v55 = vadd.f32 %v434_v61, %v433_v34  ;;  %v444_v1 = vadd.f32 %v443_v38, %v442_v33  ;;  %v447_v40 = vsel %vm363_vm1, %v1105_v35, 0.0  ;;  %v1252_v2 = vld [vmem:[#allocation2_spill] sm:$0xff] }
  0x95   :  { %v375_v12 = vrot.slane %v374_v21, 1  ;;  %v400_v45 = vadd.f32 %v399_v31, %v398_v51  ;;  %v412_v48 = vrot.slane %v411_v47, 2  ;;  %v424_v9 = vadd.f32 %v423_v5, %v422_v8  ;;  %v468_v8 = vld [vmem:[%s1166_s2] sm:$0xff] }
  0x96   :  { %v388_v41 = vrot.slane %v387_v28, 1  ;;  %v436_v29 = vrot.slane %v435_v55, 4  ;;  %v446_v57 = vadd.f32 %v445_v3, %v444_v1  ;;  %v362_v43 = vmul.f32 %v1088_v50, %v1086_v63  ;;  %v495_v31 = vld [vmem:[%s1167_s5] sm:$0xff] }
  0x97   :  { %v376_v10 = vadd.f32 %v375_v12, %v374_v21  ;;  %v401_v6 = vrot.slane %v400_v45, 1  ;;  %v413_v30 = vadd.f32 %v412_v48, %v411_v47  ;;  %v425_v54 = vrot.slane %v424_v9, 2 }
  0x98   :  { %v389_v13 = vadd.f32 %v388_v41, %v387_v28  ;;  %v437_v37 = vadd.f32 %v436_v29, %v435_v55  ;;  %v448_v7 = vadd.f32 %v447_v40, %v446_v57  ;;  %v455_v53 = vsel %vm363_vm1, %v1094_v52, 0.0 }
  0x99   :  { %v402_v25 = vadd.f32 %v401_v6, %v400_v45  ;;  %v426_v11 = vadd.f32 %v425_v54, %v424_v9  ;;  %v456_v14 = vsel %vm363_vm1, %v1107_v17, 0.0  ;;  %v414_v15 = vrot.slane %v413_v30, 1 }
  0x9a   :  { %v438_v35 = vrot.slane %v437_v37, 2  ;;  %v449_v24 = vrot.slane %v448_v7, 4  ;;  %v457_v60 = vadd.f32 %v456_v14, %v455_v53  ;;  %v458_v27 = vsel %vm363_vm1, %v1097_v22, 0.0 }
  0x9b   :  { %v478_v63 = vsel %vm477_vm2, %v389_v13, %v376_v10  ;;  %v427_v0 = vrot.slane %v426_v11, 1  ;;  %v460_v26 = vsel %vm363_vm1, %v362_v43, 0.0  ;;  %v415_v49 = vadd.f32 %v414_v15, %v413_v30 }
  0x9c   :  { %v439_v50 = vadd.f32 %v438_v35, %v437_v37  ;;  %v450_v16 = vadd.f32 %v449_v24, %v448_v7  ;;  %v459_v20 = vadd.f32 %v458_v27, %v457_v60  ;;  %v480_v52 = vsel %vm479_vm3, %v402_v25, %v478_v63 }
  0x9d   :  { %v482_v56 = vsel %vm481_vm4, %v415_v49, %v480_v52  ;;  %v428_v22 = vadd.f32 %v427_v0, %v426_v11  ;;  %v493_v34 = vmul.f32 0.1, %v1252_v2 }
  0x9e   :  { %v451_v17 = vrot.slane %v450_v16, 2  ;;  %v461_v62 = vadd.f32 %v460_v26, %v459_v20  ;;  %v440_v4 = vrot.slane %v439_v50, 1 }
  0x9f   :  { %v484_v58 = vsel %vm483_vm5, %v428_v22, %v482_v56 }
  0xa0   :  { %v452_v19 = vadd.f32 %v451_v17, %v450_v16  ;;  %v462_v46 = vrot.slane %v461_v62, 4  ;;  %v441_v44 = vadd.f32 %v440_v4, %v439_v50 }
  0xa2   :  { %v463_v18 = vadd.f32 %v462_v46, %v461_v62  ;;  %v453_v59 = vrot.slane %v452_v19, 1  ;;  %v486_v23 = vsel %vm485_vm6, %v441_v44, %v484_v58 }
  0xa4   :  { %v464_v39 = vrot.slane %v463_v18, 2  ;;  %v454_v61 = vadd.f32 %v453_v59, %v452_v19 }
  0xa6   :  { %v465_v36 = vadd.f32 %v464_v39, %v463_v18  ;;  %v488_v51 = vsel %vm487_vm7, %v454_v61, %v486_v23 }
  0xa8   :  { %v466_v42 = vrot.slane %v465_v36, 1 }
  0xaa   :  { %v467_v32 = vadd.f32 %v466_v42, %v465_v36 }
  0xac   :  { %v490_v33 = vsel %vm489_vm8, %v467_v32, %v488_v51 }
  0xad   :  { %v492_v38 = vadd.f32 %v490_v33, %v468_v8 }
  0xaf   :  { %v494_v21 = vsub.f32 %v492_v38, %v493_v34 }
  0xb1   :  { %737 = vmatpush3.msra.mxu0 %v494_v21 }
  0xb2   :  { %739 = vmatmul.mubr.msk.f32.vlgmr.msra.gmra.mxu0 %vm496_vm9, %v495_v31 }
 0x172   :  { %v566_v47 = vpop.f32.mrf.mxu0 }
 0x173   :  { %570 = vst.msk [vmem:[%s1168_s6] sm:$0xff] %vm363_vm1, %v566_v47 }
 0x174   :  { %v740_v5 = vpop.f32.mrf.mxu0 }

</bundles_post_ra>
